<compile_context>
chip_gen: v6e
topology: v6e:2x2x1
jax: 0.10.0
libtpu: 0.0.40
codegen_flags: <defaults>
</compile_context>

<pallas_src>
import functools

import jax
import jax.numpy as jnp
from jax.experimental import pallas as pl
from jax.experimental.pallas import tpu as pltpu


def _pick_tile(dim, max_tile, align=1):
    """Largest t <= max_tile with dim % t == 0, preferring multiples of `align`."""
    if dim <= max_tile:
        return dim
    best = None
    for t in range(max_tile, 0, -1):
        if dim % t == 0:
            if t % align == 0:
                return t
            if best is None:
                best = t
    return best if best is not None else dim


def conv_stats_kernel(p_ref, w_ref, y_ref, sum_ref, sq_ref, acc_ref):
    """Tiled bf16 matmul (im2col conv), f32 accumulation + per-tile BN stats."""
    k = pl.program_id(2)

    @pl.when(k == 0)
    def _():
        acc_ref[...] = jnp.zeros_like(acc_ref)

    acc_ref[...] += jnp.dot(p_ref[...], w_ref[...],
                            preferred_element_type=jnp.float32)

    @pl.when(k == pl.num_programs(2) - 1)
    def _():
        y = acc_ref[...]
        y_ref[...] = y.astype(y_ref.dtype)
        # Per-(M-tile, Cout-tile) partial statistics; reduced in the wrapper.
        sum_ref[...] = jnp.sum(y, axis=0, keepdims=True)[None]
        sq_ref[...] = jnp.sum(y * y, axis=0, keepdims=True)[None]


def bn_lrelu_kernel(y_ref, scale_ref, shift_ref, o_ref):
    """Elementwise BN affine (pre-folded per-lane scale/shift) + LeakyReLU(0.1)."""
    z = y_ref[...] * scale_ref[...] + shift_ref[...]
    o_ref[...] = jnp.where(z >= 0, z, 0.1 * z)


@functools.partial(jax.jit,
                   static_argnames=("stride", "padding", "tm", "tn_max", "tk_max"))
def convolutional_layer(x, w, gamma, beta, *, stride=1, padding=1,
                        eps=1e-5, tm=128, tn_max=256, tk_max=512):
    """x: (N, Cin, H, W); w: (Cout, Cin, KH, KW); gamma/beta: (Cout,)."""
    N, Cin, H, W = x.shape
    Cout, _, KH, KW = w.shape
    OH = (H + 2 * padding - KH) // stride + 1
    OW = (W + 2 * padding - KW) // stride + 1

    # ---- glue: im2col (NCHW -> NHWC -> bf16 patches), Cin fastest within a tap ----
    xh = jnp.transpose(x, (0, 2, 3, 1)).astype(jnp.bfloat16)
    xp = jnp.pad(xh, ((0, 0), (padding, padding), (padding, padding), (0, 0)))
    cols = []
    for kh in range(KH):
        for kw in range(KW):
            cols.append(xp[:, kh:kh + stride * OH:stride,
                            kw:kw + stride * OW:stride, :])
    patches = jnp.concatenate(cols, axis=-1).reshape(N * OH * OW, KH * KW * Cin)
    wmat = jnp.transpose(w, (2, 3, 1, 0)).reshape(KH * KW * Cin, Cout)
    wmat = wmat.astype(jnp.bfloat16)

    M, K = patches.shape
    assert M % tm == 0, "M must be divisible by the row tile"
    tn = _pick_tile(Cout, tn_max, 128)     # lane tile (128 on v5e, 256 on v6e/v7x)
    tk = _pick_tile(K, tk_max, 8)          # contraction tile
    mt, nt, kt = M // tm, Cout // tn, K // tk
    grid = (mt, nt, kt)

    # ---- Pallas kernel 1: tiled conv matmul + per-tile BN partial statistics ----
    y, psum, psq = pl.pallas_call(
        conv_stats_kernel,
        out_shape=(jax.ShapeDtypeStruct((M, Cout), jnp.float32),
                   jax.ShapeDtypeStruct((mt, 1, Cout), jnp.float32),
                   jax.ShapeDtypeStruct((mt, 1, Cout), jnp.float32)),
        grid_spec=pltpu.PrefetchScalarGridSpec(
            num_scalar_prefetch=0, grid=grid,
            in_specs=[pl.BlockSpec((tm, tk), lambda i, j, k: (i, k)),
                      pl.BlockSpec((tk, tn), lambda i, j, k: (k, j))],
            out_specs=(pl.BlockSpec((tm, tn), lambda i, j, k: (i, j)),
                       pl.BlockSpec((1, 1, tn), lambda i, j, k: (i, 0, j)),
                       pl.BlockSpec((1, 1, tn), lambda i, j, k: (i, 0, j))),
            scratch_shapes=[pltpu.VMEM((tm, tn), jnp.float32)]),
        compiler_params=pltpu.CompilerParams(
            # M and Cout axes independent (megacore on v7x); K is the reduction.
            dimension_semantics=("parallel", "parallel", "arbitrary")),
        cost_estimate=pl.CostEstimate(
            flops=2 * M * K * Cout,
            transcendentals=0,
            bytes_accessed=(patches.size * 2 + wmat.size * 2
                            + M * Cout * 4 + 2 * mt * Cout * 4)),
    )(patches, wmat)

    # ---- tiny per-channel math (training-mode BN: biased batch variance) ----
    s = jnp.sum(psum, axis=(0, 1))
    sq = jnp.sum(psq, axis=(0, 1))
    mean = s / M
    var = sq / M - mean * mean
    scale = gamma.astype(jnp.float32) * jax.lax.rsqrt(var + eps)
    shift = beta.astype(jnp.float32) - mean * scale

    # ---- Pallas kernel 2: lane-dense fused BN affine + LeakyReLU, in place ----
    if 128 % Cout == 0:
        # Fold rows into lanes: (M, Cout) row-major == (M*Cout/128, 128); lane p
        # always maps to channel p % Cout, so scale/shift are tiled across lanes.
        lanes = 128
        rep = lanes // Cout
        y2 = y.reshape((M * Cout) // lanes, lanes)
        scale2 = jnp.tile(scale, rep).reshape(1, lanes)
        shift2 = jnp.tile(shift, rep).reshape(1, lanes)
    else:
        y2 = y
        scale2 = scale.reshape(1, Cout)
        shift2 = shift.reshape(1, Cout)
    R, Lw = y2.shape
    tr = _pick_tile(R, 1024, 8)

    out2 = pl.pallas_call(
        bn_lrelu_kernel,
        out_shape=jax.ShapeDtypeStruct((R, Lw), jnp.float32),
        grid_spec=pltpu.PrefetchScalarGridSpec(
            num_scalar_prefetch=0, grid=(R // tr,),
            in_specs=[pl.BlockSpec((tr, Lw), lambda i: (i, 0)),
                      pl.BlockSpec((1, Lw), lambda i: (0, 0)),
                      pl.BlockSpec((1, Lw), lambda i: (0, 0))],
            out_specs=pl.BlockSpec((tr, Lw), lambda i: (i, 0))),
        compiler_params=pltpu.CompilerParams(
            dimension_semantics=("parallel",)),
        input_output_aliases={0: 0},   # write BN+LReLU result in place over y
    )(y2, scale2, shift2)

    # back to NCHW to match the PyTorch module
    out = out2.reshape(N, OH, OW, Cout)
    return jnp.transpose(out, (0, 3, 1, 2))


def _reference(x, w, gamma, beta, stride, padding, eps=1e-5):
    """Pure-JAX reference (bf16 conv + training-mode BN + LeakyReLU)."""
    y = jax.lax.conv_general_dilated(
        x.astype(jnp.bfloat16), w.astype(jnp.bfloat16),
        window_strides=(stride, stride),
        padding=[(padding, padding), (padding, padding)],
        dimension_numbers=("NCHW", "OIHW", "NCHW"),
        preferred_element_type=jnp.float32)
    mean = jnp.mean(y, axis=(0, 2, 3), keepdims=True)
    var = jnp.mean((y - mean) ** 2, axis=(0, 2, 3), keepdims=True)
    z = (y - mean) * jax.lax.rsqrt(var + eps)
    z = z * gamma[None, :, None, None] + beta[None, :, None, None]
    return jnp.where(z >= 0, z, 0.1 * z)


if __name__ == "__main__":
    key = jax.random.PRNGKey(0)
    k1, k2, k3, k4 = jax.random.split(key, 4)

    N, Cin, H, W = 2, 4, 16, 16
    Cout, KH, KW = 8, 3, 3
    stride, padding = 1, 1

    x = jax.random.normal(k1, (N, Cin, H, W), dtype=jnp.float32)
    w = jax.random.normal(k2, (Cout, Cin, KH, KW), dtype=jnp.float32) * 0.1
    gamma = 1.0 + 0.1 * jax.random.normal(k3, (Cout,), dtype=jnp.float32)
    beta = 0.1 * jax.random.normal(k4, (Cout,), dtype=jnp.float32)

    out = convolutional_layer(x, w, gamma, beta, stride=stride, padding=padding)
    out = jax.block_until_ready(out)

    ref = _reference(x, w, gamma, beta, stride, padding)
    assert out.shape == (N, Cout, H, W), out.shape
    assert jnp.allclose(out, ref, atol=2e-3, rtol=2e-3), \
        float(jnp.max(jnp.abs(out - ref)))

    print("KERNEL_OK")
</pallas_src>

<mosaic_0001>
module attributes {stable_mosaic.version = 11 : i64} {
  func.func @conv_stats_kernel(%arg0: i32, %arg1: i32, %arg2: i32, %arg3: memref<128x36xbf16, #tpu.memory_space<vmem>>, %arg4: memref<36x8xbf16, #tpu.memory_space<vmem>>, %arg5: memref<128x8xf32, #tpu.memory_space<vmem>>, %arg6: memref<1x1x8xf32, #tpu.memory_space<vmem>>, %arg7: memref<1x1x8xf32, #tpu.memory_space<vmem>>, %arg8: memref<128x8xf32, #tpu.memory_space<vmem>>) attributes {dimension_semantics = [#tpu.dimension_semantics<parallel>, #tpu.dimension_semantics<parallel>, #tpu.dimension_semantics<arbitrary>], iteration_bounds = array<i64: 4, 1, 1>, scalar_prefetch = 0 : i64, scratch_operands = 1 : i64, tpu.core_type = #tpu.core_type<tc>, window_params = [{transform_indices = @transform_0, window_bounds = array<i64: 128, 36>}, {transform_indices = @transform_1, window_bounds = array<i64: 36, 8>}, {transform_indices = @transform_2, window_bounds = array<i64: 128, 8>}, {transform_indices = @transform_3, window_bounds = array<i64: 1, 1, 8>}, {transform_indices = @transform_4, window_bounds = array<i64: 1, 1, 8>}]} {
    %c0_i32 = arith.constant 0 : i32
    %0 = arith.cmpi eq, %arg2, %c0_i32 : i32
    %1 = arith.extui %0 : i1 to i32
    %c0_i32_0 = arith.constant 0 : i32
    %2 = arith.cmpi ne, %1, %c0_i32_0 : i32
    scf.if %2 {
      %cst_10 = arith.constant 0.000000e+00 : f32
      %12 = vector.broadcast %cst_10 : f32 to vector<128x8xf32>
      %c0_11 = arith.constant 0 : index
      %c0_12 = arith.constant 0 : index
      %13 = vector.load %arg8[%c0_11, %c0_12] : memref<128x8xf32, #tpu.memory_space<vmem>>, vector<128x8xf32>
      tpu.vector_store %arg8[%c0_11, %c0_12], %12 {strides = array<i32>} : memref<128x8xf32, #tpu.memory_space<vmem>>, vector<128x8xf32>,
    } else {
    }
    %c0 = arith.constant 0 : index
    %c0_1 = arith.constant 0 : index
    %3 = vector.load %arg8[%c0, %c0_1] : memref<128x8xf32, #tpu.memory_space<vmem>>, vector<128x8xf32>
    %c0_2 = arith.constant 0 : index
    %c0_3 = arith.constant 0 : index
    %4 = vector.load %arg3[%c0_2, %c0_3] : memref<128x36xbf16, #tpu.memory_space<vmem>>, vector<128x36xbf16>
    %c0_4 = arith.constant 0 : index
    %c0_5 = arith.constant 0 : index
    %5 = vector.load %arg4[%c0_4, %c0_5] : memref<36x8xbf16, #tpu.memory_space<vmem>>, vector<36x8xbf16>
    %cst = arith.constant dense<0.000000e+00> : vector<128x8xf32>
    %6 = tpu.matmul %4, %5, %cst {dimension_numbers = #tpu.dot_dimension_numbers<[1], [0], [0], [1], [0, 0, 1, 1], [], []>} : vector<128x36xbf16>, vector<36x8xbf16>, vector<128x8xf32> -> vector<128x8xf32>
    %7 = arith.addf %3, %6 : vector<128x8xf32>
    %c0_6 = arith.constant 0 : index
    %c0_7 = arith.constant 0 : index
    %8 = vector.load %arg8[%c0_6, %c0_7] : memref<128x8xf32, #tpu.memory_space<vmem>>, vector<128x8xf32>
    tpu.vector_store %arg8[%c0_6, %c0_7], %7 {strides = array<i32>} : memref<128x8xf32, #tpu.memory_space<vmem>>, vector<128x8xf32>,
    %c0_i32_8 = arith.constant 0 : i32
    %9 = arith.cmpi eq, %arg2, %c0_i32_8 : i32
    %10 = arith.extui %9 : i1 to i32
    %c0_i32_9 = arith.constant 0 : i32
    %11 = arith.cmpi ne, %10, %c0_i32_9 : i32
    scf.if %11 {
      %c0_10 = arith.constant 0 : index
      %c0_11 = arith.constant 0 : index
      %12 = vector.load %arg8[%c0_10, %c0_11] : memref<128x8xf32, #tpu.memory_space<vmem>>, vector<128x8xf32>
      %c0_12 = arith.constant 0 : index
      %c0_13 = arith.constant 0 : index
      %13 = vector.load %arg5[%c0_12, %c0_13] : memref<128x8xf32, #tpu.memory_space<vmem>>, vector<128x8xf32>
      tpu.vector_store %arg5[%c0_12, %c0_13], %12 {strides = array<i32>} : memref<128x8xf32, #tpu.memory_space<vmem>>, vector<128x8xf32>,
      %cst_14 = arith.constant dense<0.000000e+00> : vector<8xf32>
      %14 = vector.multi_reduction <add>, %12, %cst_14 [0] : vector<128x8xf32> to vector<8xf32>
      %15 = vector.shape_cast %14 : vector<8xf32> to vector<1x8xf32>
      %16 = vector.shape_cast %15 : vector<1x8xf32> to vector<1x1x8xf32>
      %c0_15 = arith.constant 0 : index
      %c0_16 = arith.constant 0 : index
      %c0_17 = arith.constant 0 : index
      %17 = vector.load %arg6[%c0_15, %c0_16, %c0_17] : memref<1x1x8xf32, #tpu.memory_space<vmem>>, vector<1x1x8xf32>
      tpu.vector_store %arg6[%c0_15, %c0_16, %c0_17], %16 {strides = array<i32>} : memref<1x1x8xf32, #tpu.memory_space<vmem>>, vector<1x1x8xf32>,
      %18 = arith.mulf %12, %12 : vector<128x8xf32>
      %cst_18 = arith.constant dense<0.000000e+00> : vector<8xf32>
      %19 = vector.multi_reduction <add>, %18, %cst_18 [0] : vector<128x8xf32> to vector<8xf32>
      %20 = vector.shape_cast %19 : vector<8xf32> to vector<1x8xf32>
      %21 = vector.shape_cast %20 : vector<1x8xf32> to vector<1x1x8xf32>
      %c0_19 = arith.constant 0 : index
      %c0_20 = arith.constant 0 : index
      %c0_21 = arith.constant 0 : index
      %22 = vector.load %arg7[%c0_19, %c0_20, %c0_21] : memref<1x1x8xf32, #tpu.memory_space<vmem>>, vector<1x1x8xf32>
      tpu.vector_store %arg7[%c0_19, %c0_20, %c0_21], %21 {strides = array<i32>} : memref<1x1x8xf32, #tpu.memory_space<vmem>>, vector<1x1x8xf32>,
    } else {
    }
    return
  }
  func.func @transform_0(%arg0: i32, %arg1: i32, %arg2: i32) -> (i32, i32) {
    %c0_i32 = arith.constant 0 : i32
    return %arg0, %arg2 : i32, i32
  }
  func.func @transform_1(%arg0: i32, %arg1: i32, %arg2: i32) -> (i32, i32) {
    %c0_i32 = arith.constant 0 : i32
    return %arg2, %arg1 : i32, i32
  }
  func.func @transform_2(%arg0: i32, %arg1: i32, %arg2: i32) -> (i32, i32) {
    %c0_i32 = arith.constant 0 : i32
    return %arg0, %arg1 : i32, i32
  }
  func.func @transform_3(%arg0: i32, %arg1: i32, %arg2: i32) -> (i32, i32, i32) {
    %c0_i32 = arith.constant 0 : i32
    %c0_i32_0 = arith.constant 0 : i32
    return %arg0, %c0_i32, %arg1 : i32, i32, i32
  }
  func.func @transform_4(%arg0: i32, %arg1: i32, %arg2: i32) -> (i32, i32, i32) {
    %c0_i32 = arith.constant 0 : i32
    %c0_i32_0 = arith.constant 0 : i32
    return %arg0, %c0_i32, %arg1 : i32, i32, i32
  }
}

module attributes {stable_mosaic.version = 11 : i64} {
  func.func @bn_lrelu_kernel(%arg0: i32, %arg1: memref<32x128xf32, #tpu.memory_space<vmem>>, %arg2: memref<1x128xf32, #tpu.memory_space<vmem>>, %arg3: memref<1x128xf32, #tpu.memory_space<vmem>>, %arg4: memref<32x128xf32, #tpu.memory_space<vmem>>) attributes {dimension_semantics = [#tpu.dimension_semantics<parallel>], iteration_bounds = array<i64: 1>, scalar_prefetch = 0 : i64, scratch_operands = 0 : i64, tpu.core_type = #tpu.core_type<tc>, window_params = [{transform_indices = @transform_0, window_bounds = array<i64: 32, 128>}, {pipeline_mode = #tpu.pipeline_mode<synchronous>, transform_indices = @transform_1, window_bounds = array<i64: 1, 128>}, {pipeline_mode = #tpu.pipeline_mode<synchronous>, transform_indices = @transform_2, window_bounds = array<i64: 1, 128>}, {transform_indices = @transform_3, window_bounds = array<i64: 32, 128>}]} {
    %c0 = arith.constant 0 : index
    %c0_0 = arith.constant 0 : index
    %0 = vector.load %arg1[%c0, %c0_0] : memref<32x128xf32, #tpu.memory_space<vmem>>, vector<32x128xf32>
    %c0_1 = arith.constant 0 : index
    %c0_2 = arith.constant 0 : index
    %1 = vector.load %arg2[%c0_1, %c0_2] : memref<1x128xf32, #tpu.memory_space<vmem>>, vector<1x128xf32>
    %2 = vector.broadcast %1 : vector<1x128xf32> to vector<32x128xf32>
    %3 = arith.mulf %0, %2 : vector<32x128xf32>
    %c0_3 = arith.constant 0 : index
    %c0_4 = arith.constant 0 : index
    %4 = vector.load %arg3[%c0_3, %c0_4] : memref<1x128xf32, #tpu.memory_space<vmem>>, vector<1x128xf32>
    %5 = vector.broadcast %4 : vector<1x128xf32> to vector<32x128xf32>
    %6 = arith.addf %3, %5 : vector<32x128xf32>
    %cst = arith.constant 0.000000e+00 : f32
    %7 = vector.broadcast %cst : f32 to vector<32x128xf32>
    %8 = arith.cmpf oge, %6, %7 : vector<32x128xf32>
    %cst_5 = arith.constant 1.000000e-01 : f32
    %9 = vector.broadcast %cst_5 : f32 to vector<32x128xf32>
    %10 = arith.mulf %9, %6 : vector<32x128xf32>
    %11 = arith.select %8, %6, %10 : vector<32x128xi1>, vector<32x128xf32>
    %c0_6 = arith.constant 0 : index
    %c0_7 = arith.constant 0 : index
    %12 = vector.load %arg4[%c0_6, %c0_7] : memref<32x128xf32, #tpu.memory_space<vmem>>, vector<32x128xf32>
    tpu.vector_store %arg4[%c0_6, %c0_7], %11 {strides = array<i32>} : memref<32x128xf32, #tpu.memory_space<vmem>>, vector<32x128xf32>,
    return
  }
  func.func @transform_0(%arg0: i32) -> (i32, i32) {
    %c0_i32 = arith.constant 0 : i32
    %c0_i32_0 = arith.constant 0 : i32
    return %arg0, %c0_i32 : i32, i32
  }
  func.func @transform_1(%arg0: i32) -> (i32, i32) {
    %c0_i32 = arith.constant 0 : i32
    %c0_i32_0 = arith.constant 0 : i32
    %c0_i32_1 = arith.constant 0 : i32
    return %c0_i32, %c0_i32_0 : i32, i32
  }
  func.func @transform_2(%arg0: i32) -> (i32, i32) {
    %c0_i32 = arith.constant 0 : i32
    %c0_i32_0 = arith.constant 0 : i32
    %c0_i32_1 = arith.constant 0 : i32
    return %c0_i32, %c0_i32_0 : i32, i32
  }
  func.func @transform_3(%arg0: i32) -> (i32, i32) {
    %c0_i32 = arith.constant 0 : i32
    %c0_i32_0 = arith.constant 0 : i32
    return %arg0, %c0_i32 : i32, i32
  }
}

</mosaic_0001>

<bundles_post_ra>
// kernel: tile.13
= control target key start
LH: loop header
LB: loop body
LE: loop exit
PB: predicated region body
PF: predicated region fallthrough
CT: control target
= control target key end

     0   :  { %s28_s0 = inlined_call_operand.vmem [shape: f32[8], index: 0, kind: input, shape index: {}]   ;;  %s29_s1 = inlined_call_operand.vmem [shape: f32[16,8], index: 1, kind: output, shape index: {}]  }
   0x1   :  { %v4_v0 = vld [vmem:[%s28_s0] ss:$0 sm:$0xff] }
   0x2   :  { %5 = vst [vmem:[%s29_s1] sm:$0xff] %v4_v0  ;;  %8 = vst [vmem:[%s29_s1 + $0x8] sm:$0xff] %v4_v0 }

// kernel: tile.14
= control target key start
LH: loop header
LB: loop body
LE: loop exit
PB: predicated region body
PF: predicated region fallthrough
CT: control target
= control target key end

     0   :  { %s133_s10 = smov 120   ;;  %s134_s11 = smov 104   ;;  %vm3_vm0 = vcmask 64512   ;;  %vm9_vm1 = vcmask 1048512   ;;  %vm15_vm2 = vcmask 982912   ;;  %vm21_vm3 = vcmask 917312   ;;  %s209_s0 = inlined_call_operand.vmem [shape: f32[16,8], index: 0, kind: input, shape index: {}]   ;;  %s210_s1 = inlined_call_operand.vmem [shape: f32[1,128], index: 1, kind: output, shape index: {}]  }
   0x1   :  { %v103_v0 = vld [vmem:[%s209_s0 + $0xf] sm:$0x1]   ;;  %v105_v1 = vld [vmem:[%s209_s0 + $0xd] sm:$0x1]   ;;  %v104_v2 = vld [vmem:[%s209_s0 + $0xe] sm:$0x1]  }
   0x2   :  { %7 = vrot.lane.b32.xlu0 %v103_v0, %s133_s10  ;;  %19 = vrot.lane.b32.xlu1 %v105_v1, %s134_s11  ;;  %v106_v3 = vld [vmem:[%s209_s0 + $0xc] sm:$0x1]   ;;  %s135_s16 = smov 112   ;;  %s136_s17 = smov 96   ;;  %v107_v4 = vld [vmem:[%s209_s0 + $0xb] sm:$0x1]  }
   0x3   :  { %v108_v5 = vld [vmem:[%s209_s0 + $0xa] sm:$0x1]   ;;  %v2_v6 = vld [vmem:[%s209_s0] sm:$0x1]   ;;  %s137_s24 = smov 88   ;;  %s138_s25 = smov 80  }
   0x4   :  { %4 = vst.msk [vmem:[#allocation0] sm:$0x1] %vm3_vm0, %v2_v6   ;;  %v109_v7 = vld [vmem:[%s209_s0 + $0x9] sm:$0x1]   ;;  %v110_v8 = vld [vmem:[%s209_s0 + $0x8] sm:$0x1]  }
   0x5   :  { %s139_s30 = smov 72   ;;  %s140_s2 = smov 64   ;;  %v111_v9 = vld [vmem:[%s209_s0 + $0x7] sm:$0x1]   ;;  %v112_v10 = vld [vmem:[%s209_s0 + $0x6] sm:$0x1]  }
   0x6   :  { %13 = vrot.lane.b32.xlu0 %v104_v2, %s135_s16  ;;  %25 = vrot.lane.b32.xlu1 %v106_v3, %s136_s17  ;;  %s141_s7 = smov 56   ;;  %s142_s8 = smov 48   ;;  %v113_v11 = vld [vmem:[%s209_s0 + $0x5] sm:$0x1]   ;;  %v114_v12 = vld [vmem:[%s209_s0 + $0x4] sm:$0x1]  }
   0x7   :  { %s143_s13 = smov 40   ;;  %s144_s14 = smov 32   ;;  %v115_v13 = vld [vmem:[%s209_s0 + $0x3] sm:$0x1]   ;;  %v116_v14 = vld [vmem:[%s209_s0 + $0x2] sm:$0x1]  }
   0x8   :  { %s145_s19 = smov 24   ;;  %s146_s20 = smov 16   ;;  %v117_v15 = vld [vmem:[%s209_s0 + $0x1] sm:$0x1]   ;;  %vm27_vm4 = vcmask 851712   ;;  %vm33_vm5 = vcmask 786112  }
   0x9   :  { %s147_s0 = smov 8   ;;  %vm39_vm6 = vcmask 720512   ;;  %vm45_vm7 = vcmask 654912   ;;  %vm51_vm8 = vcmask 589312   ;;  %vm57_vm9 = vcmask 523712  }
   0xa   :  { %31 = vrot.lane.b32.xlu0 %v107_v4, %s137_s24  ;;  %37 = vrot.lane.b32.xlu1 %v108_v5, %s138_s25  ;;  %vm63_vm10 = vcmask 458112   ;;  %vm69_vm11 = vcmask 392512   ;;  %vm75_vm12 = vcmask 326912   ;;  %vm81_vm13 = vcmask 261312  }
   0xb   :  { %vm87_vm14 = vcmask 195712   ;;  %vm93_vm15 = vcmask 130112  }
   0xe   :  { %43 = vrot.lane.b32.xlu0 %v109_v7, %s139_s30  ;;  %49 = vrot.lane.b32.xlu1 %v110_v8, %s140_s2 }
  0x12   :  { %55 = vrot.lane.b32.xlu0 %v111_v9, %s141_s7  ;;  %61 = vrot.lane.b32.xlu1 %v112_v10, %s142_s8 }
  0x16   :  { %67 = vrot.lane.b32.xlu0 %v113_v11, %s143_s13  ;;  %73 = vrot.lane.b32.xlu1 %v114_v12, %s144_s14 }
  0x1a   :  { %79 = vrot.lane.b32.xlu0 %v115_v13, %s145_s19  ;;  %85 = vrot.lane.b32.xlu1 %v116_v14, %s146_s20 }
  0x1e   :  { %91 = vrot.lane.b32.xlu0 %v117_v15, %s147_s0 }
  0x74   :  { %v8_v16 = vpop.permute.xlu0 %7   ;;  %v20_v17 = vpop.permute.xlu1 %19  }
  0x75   :  { %10 = vst.msk [vmem:[#allocation0] sm:$0x1] %vm9_vm1, %v8_v16  }
  0x78   :  { %v14_v18 = vpop.permute.xlu0 %13   ;;  %v26_v19 = vpop.permute.xlu1 %25  }
  0x79   :  { %16 = vst.msk [vmem:[#allocation0] sm:$0x1] %vm15_vm2, %v14_v18  }
  0x7a   :  { %22 = vst.msk [vmem:[#allocation0] sm:$0x1] %vm21_vm3, %v20_v17  }
  0x7b   :  { %28 = vst.msk [vmem:[#allocation0] sm:$0x1] %vm27_vm4, %v26_v19  }
  0x7c   :  { %v32_v20 = vpop.permute.xlu0 %31   ;;  %v38_v21 = vpop.permute.xlu1 %37  }
  0x7d   :  { %34 = vst.msk [vmem:[#allocation0] sm:$0x1] %vm33_vm5, %v32_v20  }
  0x7e   :  { %40 = vst.msk [vmem:[#allocation0] sm:$0x1] %vm39_vm6, %v38_v21  }
  0x80   :  { %v44_v22 = vpop.permute.xlu0 %43   ;;  %v50_v23 = vpop.permute.xlu1 %49  }
  0x81   :  { %46 = vst.msk [vmem:[#allocation0] sm:$0x1] %vm45_vm7, %v44_v22  }
  0x82   :  { %52 = vst.msk [vmem:[#allocation0] sm:$0x1] %vm51_vm8, %v50_v23  }
  0x84   :  { %v56_v24 = vpop.permute.xlu0 %55   ;;  %v62_v25 = vpop.permute.xlu1 %61  }
  0x85   :  { %58 = vst.msk [vmem:[#allocation0] sm:$0x1] %vm57_vm9, %v56_v24  }
  0x86   :  { %64 = vst.msk [vmem:[#allocation0] sm:$0x1] %vm63_vm10, %v62_v25  }
  0x88   :  { %v68_v26 = vpop.permute.xlu0 %67   ;;  %v74_v27 = vpop.permute.xlu1 %73  }
  0x89   :  { %70 = vst.msk [vmem:[#allocation0] sm:$0x1] %vm69_vm11, %v68_v26  }
  0x8a   :  { %76 = vst.msk [vmem:[#allocation0] sm:$0x1] %vm75_vm12, %v74_v27  }
  0x8c   :  { %v80_v28 = vpop.permute.xlu0 %79   ;;  %v86_v29 = vpop.permute.xlu1 %85  }
  0x8d   :  { %82 = vst.msk [vmem:[#allocation0] sm:$0x1] %vm81_vm13, %v80_v28  }
  0x8e   :  { %88 = vst.msk [vmem:[#allocation0] sm:$0x1] %vm87_vm14, %v86_v29  }
  0x90   :  { %v92_v30 = vpop.permute.xlu0 %91  }
  0x91   :  { %94 = vst.msk [vmem:[#allocation0] sm:$0x1] %vm93_vm15, %v92_v30  }
  0x98   :  { %v99_v31 = vld [vmem:[#allocation0] sm:$0x1] }
  0x99   :  { %102 = vst [vmem:[%s210_s1] sm:$0x1] %v99_v31 }

// kernel: convolutional_layer.3
= control target key start
LH: loop header
LB: loop body
LE: loop exit
PB: predicated region body
PF: predicated region fallthrough
CT: control target
= control target key end

     0   :  { %s112_s0 = inlined_call_operand.vmem [shape: f32[32,128], index: 0, kind: input, shape index: {}, may-alias: {0,3}]   ;;  %s113_s1 = inlined_call_operand.vmem [shape: f32[1,128], index: 1, kind: input, shape index: {}]   ;;  %s114_s2 = inlined_call_operand.vmem [shape: f32[1,128], index: 2, kind: input, shape index: {}]   ;;  %s115_s3 = inlined_call_operand.vmem [shape: f32[32,128], index: 3, kind: output, shape index: {}, may-alias: {0,3}]  }
   0x1   :  { %v14_v0 = vld [vmem:[%s112_s0] sm:$0xff]  ;;  %v15_v4 = vld [vmem:[%s112_s0 + $0x8] sm:$0xff]  ;;  %v16_v5 = vld [vmem:[%s112_s0 + $0x10] sm:$0xff] }
   0x2   :  { %v60_v1 = vld [vmem:[%s113_s1] ss:$0 sm:$0xff]  ;;  %v17_v6 = vld [vmem:[%s112_s0 + $0x18] sm:$0xff] }
   0x3   :  { %v61_v2 = vld [vmem:[%s114_s2] ss:$0 sm:$0xff]  ;;  %v25_v3 = vmul.f32 %v60_v1, %v14_v0  ;;  %v26_v7 = vmul.f32 %v60_v1, %v15_v4  ;;  %v27_v8 = vmul.f32 %v60_v1, %v16_v5  ;;  %v28_v9 = vmul.f32 %v60_v1, %v17_v6 }
   0x5   :  { %v36_v10 = vadd.f32 %v61_v2, %v25_v3  ;;  %v37_v11 = vadd.f32 %v61_v2, %v26_v7  ;;  %v38_v12 = vadd.f32 %v61_v2, %v27_v8  ;;  %v39_v13 = vadd.f32 %v61_v2, %v28_v9 }
   0x7   :  { %vm40_vm0 = vcmp.ge.f32.partialorder %v36_v10, 0.0  ;;  %v44_v14 = vmul.f32 0.1, %v36_v10  ;;  %vm41_vm1 = vcmp.ge.f32.partialorder %v37_v11, 0.0  ;;  %v45_v15 = vmul.f32 0.1, %v37_v11 }
   0x8   :  { %vm42_vm2 = vcmp.ge.f32.partialorder %v38_v12, 0.0  ;;  %v46_v16 = vmul.f32 0.1, %v38_v12  ;;  %vm43_vm3 = vcmp.ge.f32.partialorder %v39_v13, 0.0  ;;  %v47_v18 = vmul.f32 0.1, %v39_v13 }
   0x9   :  { %v48_v17 = vsel %vm40_vm0, %v36_v10, %v44_v14  ;;  %v49_v19 = vsel %vm41_vm1, %v37_v11, %v45_v15 }
   0xa   :  { %52 = vst [vmem:[%s115_s3] sm:$0xff] %v48_v17  ;;  %v50_v20 = vsel %vm42_vm2, %v38_v12, %v46_v16  ;;  %53 = vst [vmem:[%s115_s3 + $0x8] sm:$0xff] %v49_v19  ;;  %v51_v21 = vsel %vm43_vm3, %v39_v13, %v47_v18 }
   0xb   :  { %54 = vst [vmem:[%s115_s3 + $0x10] sm:$0xff] %v50_v20  ;;  %55 = vst [vmem:[%s115_s3 + $0x18] sm:$0xff] %v51_v21 }

// kernel: convolutional_layer.2
= control target key start
LH: loop header
LB: loop body
LE: loop exit
PB: predicated region body
PF: predicated region fallthrough
CT: control target
= control target key end

     0   :  { %s1033_s15 = smov 0   ;;  %s1035_s16 = smov 0   ;;  %s1226_s0 = inlined_call_operand.vmem [shape: bf16[512,36], index: 0, kind: input, shape index: {}]   ;;  %s1227_s1 = inlined_call_operand.vmem [shape: bf16[36,8], index: 1, kind: input, shape index: {}]   ;;  %s1228_s2 = inlined_call_operand.vmem [shape: f32[512,8], index: 2, kind: output, shape index: {0}]   ;;  %s1229_s3 = inlined_call_operand.vmem [shape: f32[4,1,8], index: 3, kind: output, shape index: {1}]   ;;  %s1230_s4 = inlined_call_operand.vmem [shape: f32[4,1,8], index: 4, kind: output, shape index: {2}]  }
   0x1   :  { %s1037_s17 = smov 0  }
   0x2 LB: > { %s34_s18 = sadd.s32 1, %s1001_s16  ;;  %p880_p0 = scmp.ge.s32.totalorder %s1005_s17, 1  ;;  %s1005_s17 = sphi %s1037_s17, %s15_s17   ;;  %s1001_s16 = sphi %s1035_s16, %s1233_s16   ;;  %s997_s15 = sphi %s1033_s15, %s1232_s15  }
   0x3   : > { %p36_p1 = scmp.ge.s32.totalorder %s34_s18, 4  ;;  %p214_p2 = scmp.lt.s32.totalorder %s1005_s17, 5 }
   0x5   : > { %s1235_s18 = smov (%p36_p1, %s34_s18), 0  ;;  %p215_p3 = pnand %p880_p0, %p214_p2 }
   0x6   : > { %s881_s23 = sshll.u32 (!%p215_p3), %s997_s15, 4  ;;  %p293_p5 = scmp.lt.s32.totalorder (!%p215_p3), %s997_s15, 3 }
   0x7   : > { %218 = sbr.rel (%p215_p3) target bundleno = 280 (0x118), region = 28  ;;  %p1060_p4 = scmp.lt.s32.totalorder (!%p215_p3), %s881_s23, 63 }
   0xc   : > { %v972_v0 = vld [vmem:[%s1227_s1 + $0x10] ss:$0 sps:$4 sm:$0x33]   ;;  %vm444_vm0 = vcmask 1041408   ;;  %v973_v1 = vld [vmem:[%s1227_s1 + $0x8] sm:$0xff]   ;;  %vm310_vm1 = vcmask 64512  }
   0xd   : > { %945 = vmatprep.subr.msk.bf16.mxu0 %vm444_vm0, %v972_v0  ;;  %v446_v2 = vsel %vm444_vm0, %v972_v0, 0  ;;  %946 = vmatprep.subr.msk.bf16.mxu1 %vm444_vm0, %v972_v0  ;;  %v974_v3 = vld [vmem:[%s1227_s1] sm:$0xff]   ;;  %v1007_v4 = vmov 0.0   ;;  %s1237_s23 = smov (!%p1060_p4, %s881_s23), 63  ;;  %vm419_vm2 = vcmask 293888   ;;  %s1239_s15 = smov (!%p293_p5, %s997_s15), 3 }
   0xe   : > { %918 = vmatpush3.bf16.msra.mxu0 %v446_v2  ;;  %942 = vmatpush3.bf16.msra.mxu1 %v446_v2  ;;  %313 = vst.msk [vmem:[#allocation2 + $0x10] sm:$0xff] %vm310_vm1, %v1007_v4  ;;  %311 = vst.msk [vmem:[#allocation2] sm:$0xff] %vm310_vm1, %v1007_v4  ;;  %s882_s27 = sshll.u32 %s1237_s23, 2  ;;  %s884_s5 = sshll.u32 %s1237_s23, 3  ;;  %vm650_vm3 = vcmask 57344  }
   0xf   : > { %919 = vmatprep.subr.bf16.mxu0 %v973_v1  ;;  %940 = vmatprep.subr.bf16.mxu1 %v973_v1  ;;  %312 = vst.msk [vmem:[#allocation2 + $0x8] sm:$0xff] %vm310_vm1, %v1007_v4  ;;  %314 = vst.msk [vmem:[#allocation2 + $0x18] sm:$0xff] %vm310_vm1, %v1007_v4  ;;  %s273_s30 = scalar_lea.vmem %s1226_s0, %s882_s27  ;;  %s1108_s8 = scalar_lea.vmem %s1228_s2, %s884_s5 }
  0x10   : > { %315 = vst.msk [vmem:[#allocation2 + $0x20] sm:$0xff] %vm310_vm1, %v1007_v4  ;;  %316 = vst.msk [vmem:[#allocation2 + $0x28] sm:$0xff] %vm310_vm1, %v1007_v4  ;;  %v975_v5 = vld [vmem:[%s273_s30] sm:$0xff]   ;;  %v976_v6 = vld [vmem:[%s273_s30 + $0x8] sm:$0xff]   ;;  %s298_s11 = scalar_lea.vmem %s1229_s3, %s1239_s15  ;;  %s304_s14 = scalar_lea.vmem %s1230_s4, %s1239_s15 }
  0x11   : > { %317 = vst.msk [vmem:[#allocation2 + $0x30] sm:$0xff] %vm310_vm1, %v1007_v4  ;;  %318 = vst.msk [vmem:[#allocation2 + $0x38] sm:$0xff] %vm310_vm1, %v1007_v4  ;;  %923 = vmatprep.mubr.msk.bf16.mxu0 %vm419_vm2, %v975_v5  ;;  %v977_v7 = vld [vmem:[%s273_s30 + $0x10] sm:$0xff]   ;;  %v979_v8 = vld [vmem:[%s273_s30 + $0x20] sm:$0xff]  }
  0x12   : > { %319 = vst.msk [vmem:[#allocation2 + $0x40] sm:$0xff] %vm310_vm1, %v1007_v4  ;;  %320 = vst.msk [vmem:[#allocation2 + $0x48] sm:$0xff] %vm310_vm1, %v1007_v4  ;;  %920 = vmatpush3.bf16.msra.mxu0 %v973_v1  ;;  %943 = vmatpush3.bf16.msra.mxu1 %v973_v1  ;;  %v980_v9 = vld [vmem:[%s273_s30 + $0x28] sm:$0xff]   ;;  %v981_v10 = vld [vmem:[%s273_s30 + $0x30] sm:$0xff]  }
  0x13   : > { %321 = vst.msk [vmem:[#allocation2 + $0x50] sm:$0xff] %vm310_vm1, %v1007_v4  ;;  %322 = vst.msk [vmem:[#allocation2 + $0x58] sm:$0xff] %vm310_vm1, %v1007_v4  ;;  %921 = vmatprep.subr.bf16.mxu0 %v974_v3  ;;  %941 = vmatprep.subr.bf16.mxu1 %v974_v3  ;;  %v978_v11 = vld [vmem:[%s273_s30 + $0x18] sm:$0xff]  }
  0x14   : > { %323 = vst.msk [vmem:[#allocation2 + $0x60] sm:$0xff] %vm310_vm1, %v1007_v4  ;;  %324 = vst.msk [vmem:[#allocation2 + $0x68] sm:$0xff] %vm310_vm1, %v1007_v4  ;;  %931 = vmatprep.mubr.msk.bf16.mxu1 %vm419_vm2, %v979_v8  ;;  %v982_v12 = vld [vmem:[%s273_s30 + $0x38] sm:$0xff]  }
  0x15   : > { %325 = vst.msk [vmem:[#allocation2 + $0x70] sm:$0xff] %vm310_vm1, %v1007_v4  ;;  %326 = vst.msk [vmem:[#allocation2 + $0x78] sm:$0xff] %vm310_vm1, %v1007_v4  ;;  %v329_v13 = vld [vmem:[#allocation2 + $0x10] sm:$0xff]  ;;  %v327_v15 = vld [vmem:[#allocation2] sm:$0xff] }
  0x16   : > { %922 = vmatpush3.bf16.msra.mxu0 %v974_v3  ;;  %944 = vmatpush3.bf16.msra.mxu1 %v974_v3  ;;  %v330_v19 = vld [vmem:[#allocation2 + $0x18] sm:$0xff]  ;;  %v328_v25 = vld [vmem:[#allocation2 + $0x8] sm:$0xff] }
  0x17   : > { %v331_v37 = vld [vmem:[#allocation2 + $0x20] sm:$0xff]  ;;  %v332_v53 = vld [vmem:[#allocation2 + $0x28] sm:$0xff] }
  0x18   : > { %v333_v31 = vld [vmem:[#allocation2 + $0x30] sm:$0xff]  ;;  %v334_v46 = vld [vmem:[#allocation2 + $0x38] sm:$0xff] }
  0x19   : > { %924 = vmatmul.mubr.msk.bf16.vlgmr.msra.gmra.mxu0 %vm419_vm2, %v976_v6  ;;  %932 = vmatmul.mubr.msk.bf16.vlgmr.msra.gmra.mxu1 %vm419_vm2, %v980_v9  ;;  %v335_v21 = vld [vmem:[#allocation2 + $0x40] sm:$0xff]  ;;  %v336_v33 = vld [vmem:[#allocation2 + $0x48] sm:$0xff] }
  0x1a   : > { %927 = vmatprep.mubr.msk.bf16.mxu0 %vm419_vm2, %v977_v7  ;;  %935 = vmatprep.mubr.msk.bf16.mxu1 %vm419_vm2, %v981_v10  ;;  %v337_v16 = vld [vmem:[#allocation2 + $0x50] sm:$0xff]  ;;  %v338_v27 = vld [vmem:[#allocation2 + $0x58] sm:$0xff] }
  0x1b   : > { %v339_v48 = vld [vmem:[#allocation2 + $0x60] sm:$0xff]  ;;  %v340_v62 = vld [vmem:[#allocation2 + $0x68] sm:$0xff] }
  0x1c   : > { %v341_v39 = vld [vmem:[#allocation2 + $0x70] sm:$0xff]  ;;  %v342_v54 = vld [vmem:[#allocation2 + $0x78] sm:$0xff] }
  0x21   : > { %928 = vmatmul.mubr.msk.bf16.gmra.mxu0 %vm419_vm2, %v978_v11  ;;  %936 = vmatmul.mubr.msk.bf16.gmra.mxu1 %vm419_vm2, %v982_v12 }
  0xd9   : > { %v925_v14 = vpop.f32.mrf.mxu0  ;;  %v933_v20 = vpop.f32.mrf.mxu1 }
  0xda   : > { %v547_v17 = vadd.f32 %v925_v14, %v329_v13  ;;  %v555_v23 = vadd.f32 %v933_v20, %v337_v16 }
  0xdb   : > { %v482_v18 = vpop.f32.mrf.mxu0  ;;  %v514_v26 = vpop.f32.mrf.mxu1 }
  0xdc   : > { %564 = vst.msk [vmem:[#allocation2 + $0x10] sm:$0xff] %vm310_vm1, %v547_v17  ;;  %v545_v22 = vadd.f32 %v482_v18, %v327_v15  ;;  %572 = vst.msk [vmem:[#allocation2 + $0x50] sm:$0xff] %vm310_vm1, %v555_v23  ;;  %v553_v29 = vadd.f32 %v514_v26, %v335_v21 }
  0xdd   : > { %v926_v24 = vpop.f32.mrf.mxu0  ;;  %v934_v32 = vpop.f32.mrf.mxu1 }
  0xde   : > { %562 = vst.msk [vmem:[#allocation2] sm:$0xff] %vm310_vm1, %v545_v22  ;;  %v548_v28 = vadd.f32 %v926_v24, %v330_v19  ;;  %570 = vst.msk [vmem:[#allocation2 + $0x40] sm:$0xff] %vm310_vm1, %v553_v29  ;;  %v556_v35 = vadd.f32 %v934_v32, %v338_v27 }
  0xdf   : > { %v485_v30 = vpop.f32.mrf.mxu0  ;;  %v517_v38 = vpop.f32.mrf.mxu1 }
  0xe0   : > { %565 = vst.msk [vmem:[#allocation2 + $0x18] sm:$0xff] %vm310_vm1, %v548_v28  ;;  %v546_v34 = vadd.f32 %v485_v30, %v328_v25  ;;  %573 = vst.msk [vmem:[#allocation2 + $0x58] sm:$0xff] %vm310_vm1, %v556_v35  ;;  %v554_v41 = vadd.f32 %v517_v38, %v336_v33 }
  0xe1   : > { %v929_v36 = vpop.f32.mrf.mxu0  ;;  %v937_v44 = vpop.f32.mrf.mxu1 }
  0xe2   : > { %563 = vst.msk [vmem:[#allocation2 + $0x8] sm:$0xff] %vm310_vm1, %v546_v34  ;;  %v551_v40 = vadd.f32 %v929_v36, %v333_v31  ;;  %571 = vst.msk [vmem:[#allocation2 + $0x48] sm:$0xff] %vm310_vm1, %v554_v41  ;;  %v559_v47 = vadd.f32 %v937_v44, %v341_v39 }
  0xe3   : > { %v583_v42 = vld [vmem:[#allocation2 + $0x10] sm:$0xff]  ;;  %v498_v43 = vpop.f32.mrf.mxu0  ;;  %v530_v52 = vpop.f32.mrf.mxu1 }
  0xe4   : > { %599 = vst.msk [vmem:[%s1108_s8 + $0x10] sm:$0xff] %vm310_vm1, %v583_v42  ;;  %568 = vst.msk [vmem:[#allocation2 + $0x30] sm:$0xff] %vm310_vm1, %v551_v40  ;;  %v549_v45 = vadd.f32 %v498_v43, %v331_v37  ;;  %v1116_v50 = vld [vmem:[#allocation2 + $0x50] sm:$0xff]  ;;  %v557_v59 = vadd.f32 %v530_v52, %v339_v48  ;;  %v654_v4 = vmul.f32 %v583_v42, %v583_v42  ;;  %v616_v12 = vsel %vm310_vm1, %v583_v42, 0.0 }
  0xe5   : > { %v581_v49 = vld [vmem:[#allocation2] sm:$0xff]  ;;  %v930_v51 = vpop.f32.mrf.mxu0  ;;  %607 = vst.msk [vmem:[%s1108_s8 + $0x50] sm:$0xff] %vm310_vm1, %v1116_v50  ;;  %576 = vst.msk [vmem:[#allocation2 + $0x70] sm:$0xff] %vm310_vm1, %v559_v47  ;;  %v938_v60 = vpop.f32.mrf.mxu1 }
  0xe6   : > { %597 = vst.msk [vmem:[%s1108_s8] sm:$0xff] %vm310_vm1, %v581_v49  ;;  %566 = vst.msk [vmem:[#allocation2 + $0x20] sm:$0xff] %vm310_vm1, %v549_v45  ;;  %v552_v56 = vadd.f32 %v930_v51, %v334_v46  ;;  %v1125_v57 = vld [vmem:[#allocation2 + $0x40] sm:$0xff]  ;;  %v652_v61 = vmul.f32 %v581_v49, %v581_v49  ;;  %v560_v2 = vadd.f32 %v938_v60, %v342_v54  ;;  %v613_v5 = vsel %vm310_vm1, %v581_v49, 0.0 }
  0xe7   : > { %v584_v55 = vld [vmem:[#allocation2 + $0x18] sm:$0xff]  ;;  %v501_v58 = vpop.f32.mrf.mxu0  ;;  %605 = vst.msk [vmem:[%s1108_s8 + $0x40] sm:$0xff] %vm310_vm1, %v1125_v57  ;;  %574 = vst.msk [vmem:[#allocation2 + $0x60] sm:$0xff] %vm310_vm1, %v557_v59  ;;  %v533_v3 = vpop.f32.mrf.mxu1  ;;  %v671_v20 = vsel %vm310_vm1, %v654_v4, 0.0  ;;  %v660_v47 = vmul.f32 %v1125_v57, %v1125_v57  ;;  %v628_v52 = vsel %vm310_vm1, %v1125_v57, 0.0 }
  0xe8   : > { %600 = vst.msk [vmem:[%s1108_s8 + $0x18] sm:$0xff] %vm310_vm1, %v584_v55  ;;  %569 = vst.msk [vmem:[#allocation2 + $0x38] sm:$0xff] %vm310_vm1, %v552_v56  ;;  %v550_v0 = vadd.f32 %v501_v58, %v332_v53  ;;  %v1133_v1 = vld [vmem:[#allocation2 + $0x58] sm:$0xff]  ;;  %v558_v11 = vadd.f32 %v533_v3, %v340_v62  ;;  %v668_v13 = vsel %vm310_vm1, %v652_v61, 0.0  ;;  %v655_v14 = vmul.f32 %v584_v55, %v584_v55 }
  0xe9   : > { %v582_v63 = vld [vmem:[#allocation2 + $0x8] sm:$0xff]  ;;  %608 = vst.msk [vmem:[%s1108_s8 + $0x58] sm:$0xff] %vm310_vm1, %v1133_v1  ;;  %577 = vst.msk [vmem:[#allocation2 + $0x78] sm:$0xff] %vm310_vm1, %v560_v2  ;;  %v618_v21 = vsel %vm310_vm1, %v584_v55, 0.0  ;;  %v662_v56 = vmul.f32 %v1116_v50, %v1116_v50  ;;  %v683_v58 = vsel %vm310_vm1, %v660_v47, 0.0  ;;  %v632_v62 = vsel %vm310_vm1, %v1116_v50, 0.0 }
  0xea   : > { %598 = vst.msk [vmem:[%s1108_s8 + $0x8] sm:$0xff] %vm310_vm1, %v582_v63  ;;  %v614_v6 = vsel %vm310_vm1, %v582_v63, 0.0  ;;  %v653_v7 = vmul.f32 %v582_v63, %v582_v63  ;;  %567 = vst.msk [vmem:[#allocation2 + $0x28] sm:$0xff] %vm310_vm1, %v550_v0  ;;  %v590_v10 = vld [vmem:[#allocation2 + $0x48] sm:$0xff]  ;;  %v673_v25 = vsel %vm310_vm1, %v655_v14, 0.0  ;;  %v663_v63 = vmul.f32 %v1133_v1, %v1133_v1 }
  0xeb   : > { %v615_v8 = vadd.f32 %v614_v6, %v613_v5  ;;  %v587_v9 = vld [vmem:[#allocation2 + $0x30] sm:$0xff]  ;;  %606 = vst.msk [vmem:[%s1108_s8 + $0x48] sm:$0xff] %vm310_vm1, %v590_v10  ;;  %575 = vst.msk [vmem:[#allocation2 + $0x68] sm:$0xff] %vm310_vm1, %v558_v11  ;;  %v661_v53 = vmul.f32 %v590_v10, %v590_v10  ;;  %v630_v59 = vsel %vm310_vm1, %v590_v10, 0.0  ;;  %v687_v3 = vsel %vm310_vm1, %v662_v56, 0.0 }
  0xec   : > { %v669_v15 = vsel %vm310_vm1, %v653_v7, 0.0  ;;  %603 = vst.msk [vmem:[%s1108_s8 + $0x30] sm:$0xff] %vm310_vm1, %v587_v9  ;;  %v1152_v19 = vld [vmem:[#allocation2 + $0x70] sm:$0xff]  ;;  %v658_v34 = vmul.f32 %v587_v9, %v587_v9  ;;  %v624_v40 = vsel %vm310_vm1, %v587_v9, 0.0  ;;  %v634_v4 = vsel %vm310_vm1, %v1133_v1, 0.0 }
  0xed   : > { %v617_v16 = vadd.f32 %v616_v12, %v615_v8  ;;  %v670_v17 = vadd.f32 %v669_v15, %v668_v13  ;;  %v585_v18 = vld [vmem:[#allocation2 + $0x20] sm:$0xff]  ;;  %611 = vst.msk [vmem:[%s1108_s8 + $0x70] sm:$0xff] %vm310_vm1, %v1152_v19  ;;  %v685_v57 = vsel %vm310_vm1, %v661_v53, 0.0  ;;  %v689_v8 = vsel %vm310_vm1, %v663_v63, 0.0 }
  0xee   : > { %601 = vst.msk [vmem:[%s1108_s8 + $0x20] sm:$0xff] %vm310_vm1, %v585_v18  ;;  %v656_v22 = vmul.f32 %v585_v18, %v585_v18  ;;  %v620_v26 = vsel %vm310_vm1, %v585_v18, 0.0  ;;  %v593_v28 = vld [vmem:[#allocation2 + $0x60] sm:$0xff]  ;;  %v679_v45 = vsel %vm310_vm1, %v658_v34, 0.0  ;;  %v666_v12 = vmul.f32 %v1152_v19, %v1152_v19 }
  0xef   : > { %v672_v23 = vadd.f32 %v671_v20, %v670_v17  ;;  %v619_v24 = vadd.f32 %v618_v21, %v617_v16  ;;  %v588_v27 = vld [vmem:[#allocation2 + $0x38] sm:$0xff]  ;;  %609 = vst.msk [vmem:[%s1108_s8 + $0x60] sm:$0xff] %vm310_vm1, %v593_v28  ;;  %v664_v5 = vmul.f32 %v593_v28, %v593_v28  ;;  %v636_v9 = vsel %vm310_vm1, %v593_v28, 0.0 }
  0xf0   : > { %604 = vst.msk [vmem:[%s1108_s8 + $0x38] sm:$0xff] %vm310_vm1, %v588_v27  ;;  %v675_v31 = vsel %vm310_vm1, %v656_v22, 0.0  ;;  %v596_v33 = vld [vmem:[#allocation2 + $0x78] sm:$0xff]  ;;  %v659_v41 = vmul.f32 %v588_v27, %v588_v27  ;;  %v626_v46 = vsel %vm310_vm1, %v588_v27, 0.0  ;;  %v640_v16 = vsel %vm310_vm1, %v1152_v19, 0.0 }
  0xf1   : > { %v621_v29 = vadd.f32 %v620_v26, %v619_v24  ;;  %v674_v30 = vadd.f32 %v673_v25, %v672_v23  ;;  %v586_v32 = vld [vmem:[#allocation2 + $0x28] sm:$0xff]  ;;  %612 = vst.msk [vmem:[%s1108_s8 + $0x78] sm:$0xff] %vm310_vm1, %v596_v33  ;;  %v691_v13 = vsel %vm310_vm1, %v664_v5, 0.0  ;;  %v667_v17 = vmul.f32 %v596_v33, %v596_v33 }
  0xf2   : > { %602 = vst.msk [vmem:[%s1108_s8 + $0x28] sm:$0xff] %vm310_vm1, %v586_v32  ;;  %v622_v36 = vsel %vm310_vm1, %v586_v32, 0.0  ;;  %v657_v37 = vmul.f32 %v586_v32, %v586_v32  ;;  %v594_v39 = vld [vmem:[#allocation2 + $0x68] sm:$0xff]  ;;  %v681_v51 = vsel %vm310_vm1, %v659_v41, 0.0  ;;  %v695_v22 = vsel %vm310_vm1, %v666_v12, 0.0 }
  0xf3   : > { %v676_v35 = vadd.f32 %v675_v31, %v674_v30  ;;  %v623_v38 = vadd.f32 %v622_v36, %v621_v29  ;;  %610 = vst.msk [vmem:[%s1108_s8 + $0x68] sm:$0xff] %vm310_vm1, %v594_v39  ;;  %v665_v50 = vmul.f32 %v594_v39, %v594_v39  ;;  %v638_v14 = vsel %vm310_vm1, %v594_v39, 0.0 }
  0xf4   : > { %v677_v42 = vsel %vm310_vm1, %v657_v37, 0.0  ;;  %v642_v23 = vsel %vm310_vm1, %v596_v33, 0.0  ;;  %v697_v26 = vsel %vm310_vm1, %v667_v17, 0.0 }
  0xf5   : > { %v625_v43 = vadd.f32 %v624_v40, %v623_v38  ;;  %v678_v44 = vadd.f32 %v677_v42, %v676_v35  ;;  %v693_v18 = vsel %vm310_vm1, %v665_v50, 0.0 }
  0xf7   : > { %v680_v48 = vadd.f32 %v679_v45, %v678_v44  ;;  %v627_v49 = vadd.f32 %v626_v46, %v625_v43 }
  0xf9   : > { %v629_v54 = vadd.f32 %v628_v52, %v627_v49  ;;  %v682_v55 = vadd.f32 %v681_v51, %v680_v48 }
  0xfb   : > { %v631_v60 = vadd.f32 %v630_v59, %v629_v54  ;;  %v684_v61 = vadd.f32 %v683_v58, %v682_v55 }
  0xfd   : > { %v633_v0 = vadd.f32 %v632_v62, %v631_v60  ;;  %v686_v2 = vadd.f32 %v685_v57, %v684_v61 }
  0xff   : > { %v688_v6 = vadd.f32 %v687_v3, %v686_v2  ;;  %v635_v7 = vadd.f32 %v634_v4, %v633_v0 }
 0x101   : > { %v637_v10 = vadd.f32 %v636_v9, %v635_v7  ;;  %v690_v11 = vadd.f32 %v689_v8, %v688_v6 }
 0x103   : > { %v692_v15 = vadd.f32 %v691_v13, %v690_v11  ;;  %v639_v1 = vadd.f32 %v638_v14, %v637_v10 }
 0x105   : > { %v641_v20 = vadd.f32 %v640_v16, %v639_v1  ;;  %v694_v21 = vadd.f32 %v693_v18, %v692_v15 }
 0x107   : > { %v643_v24 = vadd.f32 %v642_v23, %v641_v20  ;;  %v696_v25 = vadd.f32 %v695_v22, %v694_v21 }
 0x109   : > { %v644_v27 = vrot.slane %v643_v24, 4  ;;  %v698_v28 = vadd.f32 %v697_v26, %v696_v25 }
 0x10b   : > { %v645_v29 = vadd.f32 %v644_v27, %v643_v24  ;;  %v699_v30 = vrot.slane %v698_v28, 4 }
 0x10d   : > { %v646_v19 = vrot.slane %v645_v29, 2  ;;  %v700_v31 = vadd.f32 %v699_v30, %v698_v28 }
 0x10f   : > { %v647_v32 = vadd.f32 %v646_v19, %v645_v29  ;;  %v701_v34 = vrot.slane %v700_v31, 2 }
 0x111   : > { %v648_v35 = vrot.slane %v647_v32, 1  ;;  %v702_v36 = vadd.f32 %v701_v34, %v700_v31 }
 0x113   : > { %v649_v33 = vadd.f32 %v648_v35, %v647_v32  ;;  %v703_v37 = vrot.slane %v702_v36, 1 }
 0x115   : > { %651 = vst.msk [vmem:[%s298_s11] sm:$0x1] %vm650_vm3, %v649_v33  ;;  %v704_v38 = vadd.f32 %v703_v37, %v702_v36 }
 0x117   : > { %705 = vst.msk [vmem:[%s304_s14] sm:$0x1] %vm650_vm3, %v704_v38 }
 0x118 PF: > { %s15_s17 = sadd.s32 1, %s1005_s17   ;;  %s1232_s15 = smov %s1001_s16 }
 0x119   : > { %p12_p6 = scmp.ge.s32.totalorder %s15_s17, 6   ;;  %s1233_s16 = smov %s1235_s18 }
 0x11b   :  { %14 = sbr.rel (!%p12_p6) target bundleno = 2 (0x2), region = 93 }

</bundles_post_ra>
